<compile_context>
chip_gen: v6e
topology: v6e:2x2x1
jax: 0.10.0
libtpu: 0.0.40
codegen_flags: <defaults>
</compile_context>

<pallas_src>
import functools

import jax
import jax.numpy as jnp
from jax import lax
from jax.experimental import pallas as pl
from jax.experimental.pallas import tpu as pltpu

_LANE = 128
_MAX_TILE_ROWS = 1024  # diminishing returns / live-set growth beyond this


def _focal_factor(one_minus_pt, gamma):
    """(1 - p_t) ** gamma, as a multiply chain when gamma is a small integer."""
    x = jnp.maximum(one_minus_pt, 0.0)  # p_t can round marginally above 1
    g = float(gamma)
    if g.is_integer() and 0.0 <= g <= 16.0:
        n = int(g)
        if n == 0:
            return jnp.ones_like(x)
        result = None
        base = x
        while n:
            if n & 1:
                result = base if result is None else result * base
            n >>= 1
            if n:
                base = base * base
        return result
    return jnp.power(x, jnp.float32(gamma))


def _batch_ce_fac(load_class, tgt, *, C, ignore_index, gamma):
    """Per-pixel CE loss and focal factor for one batch entry.

    load_class(c) -> (TS, 128) f32 logits slab for class c (loaded from VMEM).
    tgt: (TS, 128) int32 targets.
    Returns (ce, fac), each (TS, 128) f32.
    """
    # Pass 1: max over classes (plain VALU ops over dense slabs).
    m = load_class(0)
    for c in range(1, C):
        m = jnp.maximum(m, load_class(c))
    # Pass 2: exp-sum and target-logit gather fused in the same per-class loop.
    # No (C, TS, 128) iota / -inf intermediates are materialized.
    ssum = None
    logit_t = jnp.full(tgt.shape, -jnp.inf, jnp.float32)
    for c in range(C):
        lc = load_class(c)
        e = jnp.exp(lc - m)
        ssum = e if ssum is None else ssum + e
        logit_t = jnp.where(tgt == c, lc, logit_t)
    lse = jnp.log(ssum) + m
    # If target is out of range (e.g. ignore_index=255 with C=4) logit_t stays
    # -inf -> p_t = 0 -> fac = 1 (ce is forced to 0 for ignored pixels anyway).
    # TODO(synk): PyTorch probs.gather(1, target) is UB for out-of-range targets;
    #             here such pixels deterministically get p_t = 0.
    lp_t = logit_t - lse
    p_t = jnp.exp(lp_t)
    ce = jnp.where(tgt != ignore_index, -lp_t, 0.0)
    fac = _focal_factor(1.0 - p_t, gamma)
    return ce, fac


def _write_tile_partial(out_ref, prod, tile_s):
    """Reduce the (tile_s, 128) per-pixel products to a dense output block."""
    if tile_s % 8 == 0:
        # (tile_s//8, 8, 128) keeps the native sublane tiling; sum over vreg tiles.
        out_ref[0] = prod.reshape(tile_s // 8, 8, _LANE).sum(axis=0)
    else:
        out_ref[0] = jnp.sum(prod, axis=0, keepdims=True)


def _focal_fused_kernel(logits_ref, target_ref, out_ref, *,
                        B, C, S, tile_s, ignore_index, gamma, ragged):
    """Batch folded into the block: grid = (n_tiles,), no VMEM accumulators."""
    t = pl.program_id(0)
    if ragged:
        row = lax.broadcasted_iota(jnp.int32, (tile_s, _LANE), 0)
        in_bounds = (t * tile_s + row) < S
    ce_sum = None
    fac_sum = None
    for b in range(B):
        tgt = target_ref[b]
        ce, fac = _batch_ce_fac(
            lambda c, b=b: logits_ref[b, c].astype(jnp.float32),
            tgt, C=C, ignore_index=ignore_index, gamma=gamma)
        if ragged:
            # Rows past S hold garbage (OOB block read): zero both factors.
            ce = jnp.where(in_bounds, ce, 0.0)
            fac = jnp.where(in_bounds, fac, 0.0)
        ce_sum = ce if ce_sum is None else ce_sum + ce
        fac_sum = fac if fac_sum is None else fac_sum + fac
    _write_tile_partial(out_ref, ce_sum * fac_sum, tile_s)


def _focal_batched_kernel(logits_ref, target_ref, out_ref, ce_acc, fac_acc, *,
                          C, S, tile_s, ignore_index, gamma, ragged):
    """Fallback for very large B*C: grid = (n_tiles, B), VMEM accumulators."""
    t = pl.program_id(0)
    b = pl.program_id(1)

    @pl.when(b == 0)
    def _init():
        ce_acc[...] = jnp.zeros_like(ce_acc)
        fac_acc[...] = jnp.zeros_like(fac_acc)

    tgt = target_ref[0]
    ce, fac = _batch_ce_fac(
        lambda c: logits_ref[0, c].astype(jnp.float32),
        tgt, C=C, ignore_index=ignore_index, gamma=gamma)
    if ragged:
        row = lax.broadcasted_iota(jnp.int32, (tile_s, _LANE), 0)
        in_bounds = (t * tile_s + row) < S
        ce = jnp.where(in_bounds, ce, 0.0)
        fac = jnp.where(in_bounds, fac, 0.0)
    ce_acc[...] += ce
    fac_acc[...] += fac

    @pl.when(b == pl.num_programs(1) - 1)
    def _finalize():
        _write_tile_partial(out_ref, ce_acc[...] * fac_acc[...], tile_s)


def _choose_tile(S, cap_rows):
    """Pick the sublane tile size (multiple of 8 unless it spans the whole axis)."""
    if S < 16 and S <= cap_rows:
        return S, 1
    # Prefer >=2 tiles so the 'parallel' spatial axis can shard across v7x's two
    # TensorCores (one extra ~0.35us grid step on 1-TC chips: negligible).
    ts = min(cap_rows, S, ((-(-S // 2) + 7) // 8) * 8)
    ts = max(8, ts - ts % 8)
    # Prefer a divisor of S near the cap: no ragged last tile, no in-kernel mask.
    if S % 8 == 0:
        d = ts
        while d >= max(8, ts // 2):
            if S % d == 0:
                ts = d
                break
            d -= 8
    return ts, -(-S // ts)


def focal_loss_pallas(logits, target, *, ignore_index, gamma=2.0):
    """logits: (B, C, H, W) float (f32 or bf16); target: (B, H, W) int. Scalar f32."""
    B, C, H, W = logits.shape
    HW = H * W
    lb = jnp.dtype(logits.dtype).itemsize

    S = -(-HW // _LANE)
    HW_pad = S * _LANE

    lg = logits.reshape(B, C, HW)
    tg = target.reshape(B, HW).astype(jnp.int32)
    if HW_pad != HW:
        # Only a lane-alignment pad (< 128 px); common segmentation shapes skip it.
        pad = HW_pad - HW
        lg = jnp.pad(lg, ((0, 0), (0, 0), (0, pad)))
        tg = jnp.pad(tg, ((0, 0), (0, pad)), constant_values=ignore_index)
    lg = lg.reshape(B, C, S, _LANE)
    tg = tg.reshape(B, S, _LANE)

    # ---- generation-aware VMEM budget & tiling --------------------------------
    try:
        vmem_cap = int(pltpu.get_tpu_info().vmem_capacity_bytes)
    except Exception:  # pragma: no cover - no TPU visible; assume smallest (v7x)
        vmem_cap = 64 * 1024 * 1024
    budget = min(28 << 20, int(0.40 * vmem_cap))

    live_bytes_per_row = 16 * _LANE * 4  # headroom for in-kernel f32 temporaries
    per_row_fused = _LANE * (2 * B * C * lb + 2 * B * 4) + live_bytes_per_row
    per_row_batched = _LANE * (2 * C * lb + 2 * 4 + 2 * 4) + live_bytes_per_row

    use_fused = per_row_fused * min(8, S) <= budget
    per_row = per_row_fused if use_fused else per_row_batched
    cap_rows = max(min(8, S), budget // per_row)
    cap_rows = min(cap_rows, _MAX_TILE_ROWS)

    tile_s, n_tiles = _choose_tile(S, cap_rows)
    ragged = (S % tile_s) != 0
    out_rows = 8 if tile_s % 8 == 0 else 1

    if use_fused:
        kernel = functools.partial(
            _focal_fused_kernel, B=B, C=C, S=S, tile_s=tile_s,
            ignore_index=ignore_index, gamma=gamma, ragged=ragged)
        grid = (n_tiles,)
        in_specs = [
            pl.BlockSpec((B, C, tile_s, _LANE), lambda t: (0, 0, t, 0)),
            pl.BlockSpec((B, tile_s, _LANE), lambda t: (0, t, 0)),
        ]
        out_specs = pl.BlockSpec((1, out_rows, _LANE), lambda t: (t, 0, 0))
        scratch = []
        dims = ("parallel",)
    else:
        kernel = functools.partial(
            _focal_batched_kernel, C=C, S=S, tile_s=tile_s,
            ignore_index=ignore_index, gamma=gamma, ragged=ragged)
        grid = (n_tiles, B)
        in_specs = [
            pl.BlockSpec((1, C, tile_s, _LANE), lambda t, b: (b, 0, t, 0)),
            pl.BlockSpec((1, tile_s, _LANE), lambda t, b: (b, t, 0)),
        ]
        out_specs = pl.BlockSpec((1, out_rows, _LANE), lambda t, b: (t, 0, 0))
        scratch = [pltpu.VMEM((tile_s, _LANE), jnp.float32),   # ce_sum
                   pltpu.VMEM((tile_s, _LANE), jnp.float32)]   # fac_sum
        dims = ("parallel", "arbitrary")

    out_bytes = n_tiles * out_rows * _LANE * 4
    cost = pl.CostEstimate(
        flops=int(8 * C * B * HW_pad),
        transcendentals=int((C + 2) * B * HW_pad),
        bytes_accessed=int(B * C * HW_pad * lb + B * HW_pad * 4 + out_bytes))

    vmem_limit = int(min(0.75 * vmem_cap, 96 << 20))

    partials = pl.pallas_call(
        kernel,
        out_shape=jax.ShapeDtypeStruct((n_tiles, out_rows, _LANE), jnp.float32),
        grid_spec=pltpu.PrefetchScalarGridSpec(
            num_scalar_prefetch=0,
            grid=grid,
            in_specs=in_specs,
            out_specs=out_specs,
            scratch_shapes=scratch,
        ),
        compiler_params=pltpu.CompilerParams(
            dimension_semantics=dims,
            vmem_limit_bytes=vmem_limit),
        cost_estimate=cost,
    )(lg, tg)

    denom = float(B) * float(B) * float(HW)   # exact in Python, cast once
    return jnp.sum(partials) / jnp.float32(denom)


def focal_loss_ref(logits, target, *, ignore_index, gamma=2.0):
    """Pure-JAX reference reproducing the exact PyTorch broadcasting."""
    B, C, H, W = logits.shape
    lse = jax.scipy.special.logsumexp(logits, axis=1, keepdims=True)
    log_probs = logits - lse
    probs = jnp.exp(log_probs)
    one_hot = jnp.arange(C)[None, :, None, None] == target[:, None, :, :]
    lp_t = jnp.sum(jnp.where(one_hot, log_probs, 0.0), axis=1)            # (B,H,W)
    p_t = jnp.sum(jnp.where(one_hot, probs, 0.0), axis=1, keepdims=True)  # (B,1,H,W)
    ce = jnp.where(target == ignore_index, 0.0, -lp_t)                    # (B,H,W)
    focal = ce * (1.0 - p_t) ** gamma      # broadcasts to (B, B, H, W) like PyTorch
    return jnp.mean(focal)


if __name__ == "__main__":
    B, C, H, W = 2, 4, 16, 16
    ignore_index = 255
    gamma = 2.0

    key = jax.random.PRNGKey(0)
    k1, k2 = jax.random.split(key)
    logits = jax.random.normal(k1, (B, C, H, W), dtype=jnp.float32)
    target = jax.random.randint(k2, (B, H, W), 0, C, dtype=jnp.int32)

    out = focal_loss_pallas(logits, target, ignore_index=ignore_index, gamma=gamma)
    out = jax.block_until_ready(out)

    ref = focal_loss_ref(logits, target, ignore_index=ignore_index, gamma=gamma)
    assert jnp.allclose(out, ref, rtol=1e-5, atol=1e-6), (out, ref)

    print("KERNEL_OK")
</pallas_src>

<mosaic_0001>
module attributes {stable_mosaic.version = 11 : i64} {
  func.func @_focal_fused_kernel(%arg0: i32, %arg1: memref<2x4x2x128xf32, #tpu.memory_space<vmem>>, %arg2: memref<2x2x128xi32, #tpu.memory_space<vmem>>, %arg3: memref<1x1x128xf32, #tpu.memory_space<vmem>>) attributes {dimension_semantics = [#tpu.dimension_semantics<parallel>], iteration_bounds = array<i64: 1>, scalar_prefetch = 0 : i64, scratch_operands = 0 : i64, tpu.core_type = #tpu.core_type<tc>, window_params = [{transform_indices = @transform_0, window_bounds = array<i64: 2, 4, 2, 128>}, {transform_indices = @transform_1, window_bounds = array<i64: 2, 2, 128>}, {transform_indices = @transform_2, window_bounds = array<i64: 1, 1, 128>}]} {
    %c0 = arith.constant 0 : index
    %c0_0 = arith.constant 0 : index
    %c0_1 = arith.constant 0 : index
    %0 = vector.load %arg2[%c0, %c0_0, %c0_1] : memref<2x2x128xi32, #tpu.memory_space<vmem>>, vector<1x2x128xi32>
    %1 = vector.shape_cast %0 : vector<1x2x128xi32> to vector<2x128xi32>
    %c0_2 = arith.constant 0 : index
    %c0_3 = arith.constant 0 : index
    %c0_4 = arith.constant 0 : index
    %c0_5 = arith.constant 0 : index
    %2 = vector.load %arg1[%c0_2, %c0_3, %c0_4, %c0_5] : memref<2x4x2x128xf32, #tpu.memory_space<vmem>>, vector<1x1x2x128xf32>
    %3 = vector.shape_cast %2 : vector<1x1x2x128xf32> to vector<2x128xf32>
    %c0_6 = arith.constant 0 : index
    %c1 = arith.constant 1 : index
    %c0_7 = arith.constant 0 : index
    %c0_8 = arith.constant 0 : index
    %4 = vector.load %arg1[%c0_6, %c1, %c0_7, %c0_8] : memref<2x4x2x128xf32, #tpu.memory_space<vmem>>, vector<1x1x2x128xf32>
    %5 = vector.shape_cast %4 : vector<1x1x2x128xf32> to vector<2x128xf32>
    %6 = arith.maximumf %3, %5 : vector<2x128xf32>
    %c0_9 = arith.constant 0 : index
    %c2 = arith.constant 2 : index
    %c0_10 = arith.constant 0 : index
    %c0_11 = arith.constant 0 : index
    %7 = vector.load %arg1[%c0_9, %c2, %c0_10, %c0_11] : memref<2x4x2x128xf32, #tpu.memory_space<vmem>>, vector<1x1x2x128xf32>
    %8 = vector.shape_cast %7 : vector<1x1x2x128xf32> to vector<2x128xf32>
    %9 = arith.maximumf %6, %8 : vector<2x128xf32>
    %c0_12 = arith.constant 0 : index
    %c3 = arith.constant 3 : index
    %c0_13 = arith.constant 0 : index
    %c0_14 = arith.constant 0 : index
    %10 = vector.load %arg1[%c0_12, %c3, %c0_13, %c0_14] : memref<2x4x2x128xf32, #tpu.memory_space<vmem>>, vector<1x1x2x128xf32>
    %11 = vector.shape_cast %10 : vector<1x1x2x128xf32> to vector<2x128xf32>
    %12 = arith.maximumf %9, %11 : vector<2x128xf32>
    %cst = arith.constant 0xFF800000 : f32
    %13 = vector.broadcast %cst : f32 to vector<2x128xf32>
    %c0_15 = arith.constant 0 : index
    %c0_16 = arith.constant 0 : index
    %c0_17 = arith.constant 0 : index
    %c0_18 = arith.constant 0 : index
    %14 = vector.load %arg1[%c0_15, %c0_16, %c0_17, %c0_18] : memref<2x4x2x128xf32, #tpu.memory_space<vmem>>, vector<1x1x2x128xf32>
    %15 = vector.shape_cast %14 : vector<1x1x2x128xf32> to vector<2x128xf32>
    %16 = arith.subf %15, %12 : vector<2x128xf32>
    %17 = math.exp %16 : vector<2x128xf32>
    %c0_i32 = arith.constant 0 : i32
    %18 = vector.broadcast %c0_i32 : i32 to vector<2x128xi32>
    %19 = arith.cmpi eq, %1, %18 : vector<2x128xi32>
    %20 = arith.select %19, %15, %13 : vector<2x128xi1>, vector<2x128xf32>
    %c0_19 = arith.constant 0 : index
    %c1_20 = arith.constant 1 : index
    %c0_21 = arith.constant 0 : index
    %c0_22 = arith.constant 0 : index
    %21 = vector.load %arg1[%c0_19, %c1_20, %c0_21, %c0_22] : memref<2x4x2x128xf32, #tpu.memory_space<vmem>>, vector<1x1x2x128xf32>
    %22 = vector.shape_cast %21 : vector<1x1x2x128xf32> to vector<2x128xf32>
    %23 = arith.subf %22, %12 : vector<2x128xf32>
    %24 = math.exp %23 : vector<2x128xf32>
    %25 = arith.addf %17, %24 : vector<2x128xf32>
    %c1_i32 = arith.constant 1 : i32
    %26 = vector.broadcast %c1_i32 : i32 to vector<2x128xi32>
    %27 = arith.cmpi eq, %1, %26 : vector<2x128xi32>
    %28 = arith.select %27, %22, %20 : vector<2x128xi1>, vector<2x128xf32>
    %c0_23 = arith.constant 0 : index
    %c2_24 = arith.constant 2 : index
    %c0_25 = arith.constant 0 : index
    %c0_26 = arith.constant 0 : index
    %29 = vector.load %arg1[%c0_23, %c2_24, %c0_25, %c0_26] : memref<2x4x2x128xf32, #tpu.memory_space<vmem>>, vector<1x1x2x128xf32>
    %30 = vector.shape_cast %29 : vector<1x1x2x128xf32> to vector<2x128xf32>
    %31 = arith.subf %30, %12 : vector<2x128xf32>
    %32 = math.exp %31 : vector<2x128xf32>
    %33 = arith.addf %25, %32 : vector<2x128xf32>
    %c2_i32 = arith.constant 2 : i32
    %34 = vector.broadcast %c2_i32 : i32 to vector<2x128xi32>
    %35 = arith.cmpi eq, %1, %34 : vector<2x128xi32>
    %36 = arith.select %35, %30, %28 : vector<2x128xi1>, vector<2x128xf32>
    %c0_27 = arith.constant 0 : index
    %c3_28 = arith.constant 3 : index
    %c0_29 = arith.constant 0 : index
    %c0_30 = arith.constant 0 : index
    %37 = vector.load %arg1[%c0_27, %c3_28, %c0_29, %c0_30] : memref<2x4x2x128xf32, #tpu.memory_space<vmem>>, vector<1x1x2x128xf32>
    %38 = vector.shape_cast %37 : vector<1x1x2x128xf32> to vector<2x128xf32>
    %39 = arith.subf %38, %12 : vector<2x128xf32>
    %40 = math.exp %39 : vector<2x128xf32>
    %41 = arith.addf %33, %40 : vector<2x128xf32>
    %c3_i32 = arith.constant 3 : i32
    %42 = vector.broadcast %c3_i32 : i32 to vector<2x128xi32>
    %43 = arith.cmpi eq, %1, %42 : vector<2x128xi32>
    %44 = arith.select %43, %38, %36 : vector<2x128xi1>, vector<2x128xf32>
    %45 = math.log %41 : vector<2x128xf32>
    %46 = arith.addf %45, %12 : vector<2x128xf32>
    %47 = arith.subf %44, %46 : vector<2x128xf32>
    %48 = math.exp %47 : vector<2x128xf32>
    %c255_i32 = arith.constant 255 : i32
    %49 = vector.broadcast %c255_i32 : i32 to vector<2x128xi32>
    %50 = arith.cmpi ne, %1, %49 : vector<2x128xi32>
    %cst_31 = arith.constant 0.000000e+00 : f32
    %51 = vector.broadcast %cst_31 : f32 to vector<2x128xf32>
    %52 = arith.subf %51, %47 : vector<2x128xf32>
    %cst_32 = arith.constant 0.000000e+00 : f32
    %53 = vector.broadcast %cst_32 : f32 to vector<2x128xf32>
    %54 = arith.select %50, %52, %53 : vector<2x128xi1>, vector<2x128xf32>
    %cst_33 = arith.constant 1.000000e+00 : f32
    %55 = vector.broadcast %cst_33 : f32 to vector<2x128xf32>
    %56 = arith.subf %55, %48 : vector<2x128xf32>
    %cst_34 = arith.constant 0.000000e+00 : f32
    %57 = vector.broadcast %cst_34 : f32 to vector<2x128xf32>
    %58 = arith.maximumf %56, %57 : vector<2x128xf32>
    %59 = arith.mulf %58, %58 : vector<2x128xf32>
    %c1_35 = arith.constant 1 : index
    %c0_36 = arith.constant 0 : index
    %c0_37 = arith.constant 0 : index
    %60 = vector.load %arg2[%c1_35, %c0_36, %c0_37] : memref<2x2x128xi32, #tpu.memory_space<vmem>>, vector<1x2x128xi32>
    %61 = vector.shape_cast %60 : vector<1x2x128xi32> to vector<2x128xi32>
    %c1_38 = arith.constant 1 : index
    %c0_39 = arith.constant 0 : index
    %c0_40 = arith.constant 0 : index
    %c0_41 = arith.constant 0 : index
    %62 = vector.load %arg1[%c1_38, %c0_39, %c0_40, %c0_41] : memref<2x4x2x128xf32, #tpu.memory_space<vmem>>, vector<1x1x2x128xf32>
    %63 = vector.shape_cast %62 : vector<1x1x2x128xf32> to vector<2x128xf32>
    %c1_42 = arith.constant 1 : index
    %c1_43 = arith.constant 1 : index
    %c0_44 = arith.constant 0 : index
    %c0_45 = arith.constant 0 : index
    %64 = vector.load %arg1[%c1_42, %c1_43, %c0_44, %c0_45] : memref<2x4x2x128xf32, #tpu.memory_space<vmem>>, vector<1x1x2x128xf32>
    %65 = vector.shape_cast %64 : vector<1x1x2x128xf32> to vector<2x128xf32>
    %66 = arith.maximumf %63, %65 : vector<2x128xf32>
    %c1_46 = arith.constant 1 : index
    %c2_47 = arith.constant 2 : index
    %c0_48 = arith.constant 0 : index
    %c0_49 = arith.constant 0 : index
    %67 = vector.load %arg1[%c1_46, %c2_47, %c0_48, %c0_49] : memref<2x4x2x128xf32, #tpu.memory_space<vmem>>, vector<1x1x2x128xf32>
    %68 = vector.shape_cast %67 : vector<1x1x2x128xf32> to vector<2x128xf32>
    %69 = arith.maximumf %66, %68 : vector<2x128xf32>
    %c1_50 = arith.constant 1 : index
    %c3_51 = arith.constant 3 : index
    %c0_52 = arith.constant 0 : index
    %c0_53 = arith.constant 0 : index
    %70 = vector.load %arg1[%c1_50, %c3_51, %c0_52, %c0_53] : memref<2x4x2x128xf32, #tpu.memory_space<vmem>>, vector<1x1x2x128xf32>
    %71 = vector.shape_cast %70 : vector<1x1x2x128xf32> to vector<2x128xf32>
    %72 = arith.maximumf %69, %71 : vector<2x128xf32>
    %cst_54 = arith.constant 0xFF800000 : f32
    %73 = vector.broadcast %cst_54 : f32 to vector<2x128xf32>
    %c1_55 = arith.constant 1 : index
    %c0_56 = arith.constant 0 : index
    %c0_57 = arith.constant 0 : index
    %c0_58 = arith.constant 0 : index
    %74 = vector.load %arg1[%c1_55, %c0_56, %c0_57, %c0_58] : memref<2x4x2x128xf32, #tpu.memory_space<vmem>>, vector<1x1x2x128xf32>
    %75 = vector.shape_cast %74 : vector<1x1x2x128xf32> to vector<2x128xf32>
    %76 = arith.subf %75, %72 : vector<2x128xf32>
    %77 = math.exp %76 : vector<2x128xf32>
    %c0_i32_59 = arith.constant 0 : i32
    %78 = vector.broadcast %c0_i32_59 : i32 to vector<2x128xi32>
    %79 = arith.cmpi eq, %61, %78 : vector<2x128xi32>
    %80 = arith.select %79, %75, %73 : vector<2x128xi1>, vector<2x128xf32>
    %c1_60 = arith.constant 1 : index
    %c1_61 = arith.constant 1 : index
    %c0_62 = arith.constant 0 : index
    %c0_63 = arith.constant 0 : index
    %81 = vector.load %arg1[%c1_60, %c1_61, %c0_62, %c0_63] : memref<2x4x2x128xf32, #tpu.memory_space<vmem>>, vector<1x1x2x128xf32>
    %82 = vector.shape_cast %81 : vector<1x1x2x128xf32> to vector<2x128xf32>
    %83 = arith.subf %82, %72 : vector<2x128xf32>
    %84 = math.exp %83 : vector<2x128xf32>
    %85 = arith.addf %77, %84 : vector<2x128xf32>
    %c1_i32_64 = arith.constant 1 : i32
    %86 = vector.broadcast %c1_i32_64 : i32 to vector<2x128xi32>
    %87 = arith.cmpi eq, %61, %86 : vector<2x128xi32>
    %88 = arith.select %87, %82, %80 : vector<2x128xi1>, vector<2x128xf32>
    %c1_65 = arith.constant 1 : index
    %c2_66 = arith.constant 2 : index
    %c0_67 = arith.constant 0 : index
    %c0_68 = arith.constant 0 : index
    %89 = vector.load %arg1[%c1_65, %c2_66, %c0_67, %c0_68] : memref<2x4x2x128xf32, #tpu.memory_space<vmem>>, vector<1x1x2x128xf32>
    %90 = vector.shape_cast %89 : vector<1x1x2x128xf32> to vector<2x128xf32>
    %91 = arith.subf %90, %72 : vector<2x128xf32>
    %92 = math.exp %91 : vector<2x128xf32>
    %93 = arith.addf %85, %92 : vector<2x128xf32>
    %c2_i32_69 = arith.constant 2 : i32
    %94 = vector.broadcast %c2_i32_69 : i32 to vector<2x128xi32>
    %95 = arith.cmpi eq, %61, %94 : vector<2x128xi32>
    %96 = arith.select %95, %90, %88 : vector<2x128xi1>, vector<2x128xf32>
    %c1_70 = arith.constant 1 : index
    %c3_71 = arith.constant 3 : index
    %c0_72 = arith.constant 0 : index
    %c0_73 = arith.constant 0 : index
    %97 = vector.load %arg1[%c1_70, %c3_71, %c0_72, %c0_73] : memref<2x4x2x128xf32, #tpu.memory_space<vmem>>, vector<1x1x2x128xf32>
    %98 = vector.shape_cast %97 : vector<1x1x2x128xf32> to vector<2x128xf32>
    %99 = arith.subf %98, %72 : vector<2x128xf32>
    %100 = math.exp %99 : vector<2x128xf32>
    %101 = arith.addf %93, %100 : vector<2x128xf32>
    %c3_i32_74 = arith.constant 3 : i32
    %102 = vector.broadcast %c3_i32_74 : i32 to vector<2x128xi32>
    %103 = arith.cmpi eq, %61, %102 : vector<2x128xi32>
    %104 = arith.select %103, %98, %96 : vector<2x128xi1>, vector<2x128xf32>
    %105 = math.log %101 : vector<2x128xf32>
    %106 = arith.addf %105, %72 : vector<2x128xf32>
    %107 = arith.subf %104, %106 : vector<2x128xf32>
    %108 = math.exp %107 : vector<2x128xf32>
    %c255_i32_75 = arith.constant 255 : i32
    %109 = vector.broadcast %c255_i32_75 : i32 to vector<2x128xi32>
    %110 = arith.cmpi ne, %61, %109 : vector<2x128xi32>
    %cst_76 = arith.constant 0.000000e+00 : f32
    %111 = vector.broadcast %cst_76 : f32 to vector<2x128xf32>
    %112 = arith.subf %111, %107 : vector<2x128xf32>
    %cst_77 = arith.constant 0.000000e+00 : f32
    %113 = vector.broadcast %cst_77 : f32 to vector<2x128xf32>
    %114 = arith.select %110, %112, %113 : vector<2x128xi1>, vector<2x128xf32>
    %cst_78 = arith.constant 1.000000e+00 : f32
    %115 = vector.broadcast %cst_78 : f32 to vector<2x128xf32>
    %116 = arith.subf %115, %108 : vector<2x128xf32>
    %cst_79 = arith.constant 0.000000e+00 : f32
    %117 = vector.broadcast %cst_79 : f32 to vector<2x128xf32>
    %118 = arith.maximumf %116, %117 : vector<2x128xf32>
    %119 = arith.mulf %118, %118 : vector<2x128xf32>
    %120 = arith.addf %54, %114 : vector<2x128xf32>
    %121 = arith.addf %59, %119 : vector<2x128xf32>
    %122 = arith.mulf %120, %121 : vector<2x128xf32>
    %cst_80 = arith.constant dense<0.000000e+00> : vector<128xf32>
    %123 = vector.multi_reduction <add>, %122, %cst_80 [0] : vector<2x128xf32> to vector<128xf32>
    %124 = vector.shape_cast %123 : vector<128xf32> to vector<1x128xf32>
    %c0_81 = arith.constant 0 : index
    %c0_82 = arith.constant 0 : index
    %c0_83 = arith.constant 0 : index
    %125 = vector.load %arg3[%c0_81, %c0_82, %c0_83] : memref<1x1x128xf32, #tpu.memory_space<vmem>>, vector<1x1x128xf32>
    %126 = vector.shape_cast %125 : vector<1x1x128xf32> to vector<1x128xf32>
    %127 = vector.shape_cast %124 : vector<1x128xf32> to vector<1x1x128xf32>
    tpu.vector_store %arg3[%c0_81, %c0_82, %c0_83], %127 {strides = array<i32>} : memref<1x1x128xf32, #tpu.memory_space<vmem>>, vector<1x1x128xf32>,
    return
  }
  func.func @transform_0(%arg0: i32) -> (i32, i32, i32, i32) {
    %c0_i32 = arith.constant 0 : i32
    %c0_i32_0 = arith.constant 0 : i32
    %c0_i32_1 = arith.constant 0 : i32
    %c0_i32_2 = arith.constant 0 : i32
    return %c0_i32, %c0_i32_0, %arg0, %c0_i32_1 : i32, i32, i32, i32
  }
  func.func @transform_1(%arg0: i32) -> (i32, i32, i32) {
    %c0_i32 = arith.constant 0 : i32
    %c0_i32_0 = arith.constant 0 : i32
    %c0_i32_1 = arith.constant 0 : i32
    return %c0_i32, %arg0, %c0_i32_0 : i32, i32, i32
  }
  func.func @transform_2(%arg0: i32) -> (i32, i32, i32) {
    %c0_i32 = arith.constant 0 : i32
    %c0_i32_0 = arith.constant 0 : i32
    %c0_i32_1 = arith.constant 0 : i32
    return %arg0, %c0_i32, %c0_i32_0 : i32, i32, i32
  }
}

</mosaic_0001>

<bundles_post_ra>
// kernel: tpu_custom_call.1
= control target key start
LH: loop header
LB: loop body
LE: loop exit
PB: predicated region body
PF: predicated region fallthrough
CT: control target
= control target key end

     0   :  { %7 = vsyncpa [#allocation3], 0  ;;  %s301_s0 = inlined_call_operand.hbm [shape: f32[2,4,2,128], index: 0, kind: input, shape index: {}]   ;;  %s302_s1 = inlined_call_operand.hbm [shape: s32[2,2,128], index: 1, kind: input, shape index: {}]   ;;  %s303_s2 = inlined_call_operand.hbm [shape: f32[1,1,128], index: 2, kind: output, shape index: {}]  }
   0x1   :  { %8 = vsyncpa [#allocation6], 0 }
   0x2   :  { %9 = vsyncpa [#allocation4], 0  ;;  %s257_s9 = smov [#allocation2]  }
   0x3   :  { %s15_s10 = sshll.u32 %s257_s9, 4  ;;  %s16_s10 = int_to_ptr.vmem [resolvable:$true] %s15_s10 }
   0x4   :  { %s199_s11 = scalar_lea.vmem %s16_s10, 256  ;;  %p204_p1 = scmp.lt.s32.totalorder %s16_s10, %s16_s10 }
   0x5   :  { %p200_p0 = scmp.ne.s32.totalorder %s16_s10, %s199_s11  ;;  %p205_p2 = scmp.lt.s32.totalorder %s199_s11, %s199_s11 }
   0x7   :  { %p206_p3 = por %p205_p2, %p204_p1 }
   0x9   :  { %p207_p4 = pnand %p206_p3, %p200_p0 }
   0xb   :  { %210 = shalt.err (!%p207_p4)
}
   0xc   :  { %s258_s12 = smov 32   ;;  %s259_s13 = smov 2  }
   0xd   :  { %21 = dma.hbm_to_vmem [thread:$0]  %s301_s0, 256, %s16_s10, [#allocation3], %s258_s12, %s258_s12, %s259_s13  }
   0xe   :  { %s260_s16 = smov [#allocation5]  }
   0xf   :  { %s27_s17 = sshll.u32 %s260_s16, 4  ;;  %s28_s17 = int_to_ptr.vmem [resolvable:$true] %s27_s17 }
  0x10   :  { %s219_s18 = scalar_lea.vmem %s28_s17, 64  ;;  %p224_p6 = scmp.lt.s32.totalorder %s28_s17, %s28_s17 }
  0x11   :  { %p220_p5 = scmp.ne.s32.totalorder %s28_s17, %s219_s18  ;;  %p225_p7 = scmp.lt.s32.totalorder %s219_s18, %s219_s18 }
  0x13   :  { %p226_p8 = por %p225_p7, %p224_p6 }
  0x15   :  { %p227_p9 = pnand %p226_p8, %p220_p5 }
  0x17   :  { %230 = shalt.err (!%p227_p9)
}
  0x18   :  { %33 = dma.hbm_to_vmem [thread:$0]  %s302_s1, 64, %s28_s17, [#allocation6], %s258_s12, %s258_s12, %s259_s13  }
  0x19   :  { %251 = dma.done.wait [#allocation3], 256  }
  0x1a   :  { %252 = vsyncadd [#allocation3], 4294967040 }
  0x1b   :  { %253 = dma.done.wait [#allocation6], 64  }
  0x1c   :  { %254 = vsyncadd [#allocation6], 4294967232  ;;  %v41_v0 = vld [vmem:[#allocation2] sm:$0x3]  ;;  %v43_v1 = vld [vmem:[#allocation2 + $0x2] sm:$0x3] }
  0x1d   :  { %v44_v2 = vmax.f32 %v41_v0, %v43_v1  ;;  %v46_v3 = vld [vmem:[#allocation2 + $0x4] sm:$0x3]  ;;  %v283_v4 = vld [vmem:[#allocation2 + $0x6] sm:$0x3]  ;;  %v89_v6 = vld [vmem:[#allocation2 + $0x8] sm:$0x3] }
  0x1e   :  { %v91_v7 = vld [vmem:[#allocation2 + $0xa] sm:$0x3]  ;;  %v285_v8 = vld [vmem:[#allocation2 + $0xc] sm:$0x3]  ;;  %v288_v11 = vld [vmem:[#allocation2 + $0xe] sm:$0x3] }
  0x1f   :  { %v47_v5 = vmax.f32 %v44_v2, %v46_v3  ;;  %v92_v9 = vmax.f32 %v89_v6, %v91_v7  ;;  %v40_v42 = vld [vmem:[#allocation5] sm:$0x3]  ;;  %v87_v45 = vld [vmem:[#allocation5 + $0x2] sm:$0x3]  ;;  %vm137_vm10 = vcmask 1041408   ;;  %s261_s0 = smov [#allocation7]  }
  0x20   :  { %vm54_vm0 = vcmp.eq.s32.totalorder %v40_v42, 0  ;;  %vm60_vm1 = vcmp.eq.s32.totalorder %v40_v42, 1  ;;  %vm102_vm2 = vcmp.eq.s32.totalorder %v87_v45, 0  ;;  %vm66_vm3 = vcmp.eq.s32.totalorder %v40_v42, 2  ;;  %s152_s1 = sshll.u32 %s261_s0, 4  ;;  %s153_s1 = int_to_ptr.vmem [resolvable:$true] %s152_s1 }
  0x21   :  { %v50_v10 = vmax.f32 %v47_v5, %v283_v4  ;;  %v95_v12 = vmax.f32 %v92_v9, %v285_v8  ;;  %v55_v46 = vsel %vm54_vm0, %v41_v0, -inf  ;;  %v103_v48 = vsel %vm102_vm2, %v89_v6, -inf  ;;  %s231_s21 = scalar_lea.vmem %s153_s1, 16  ;;  %s235_s22 = scalar_lea.vmem %s153_s1, 32 }
  0x22   :  { %v61_v47 = vsel %vm60_vm1, %v43_v1, %v55_v46  ;;  %vm108_vm4 = vcmp.eq.s32.totalorder %v87_v45, 1  ;;  %vm72_vm5 = vcmp.eq.s32.totalorder %v40_v42, 3  ;;  %vm114_vm6 = vcmp.eq.s32.totalorder %v87_v45, 2  ;;  %p232_p10 = scmp.ne.s32.totalorder %s153_s1, %s231_s21  ;;  %p236_p11 = scmp.lt.s32.totalorder %s153_s1, %s153_s1 }
  0x23   :  { %v51_v13 = vsub.f32 %v41_v0, %v50_v10  ;;  %v56_v14 = vsub.f32 %v43_v1, %v50_v10  ;;  %v62_v15 = vsub.f32 %v46_v3, %v50_v10  ;;  %v68_v16 = vsub.f32 %v283_v4, %v50_v10  ;;  %p237_p12 = scmp.lt.s32.totalorder %s235_s22, %s231_s21 }
  0x24   :  { %v98_v17 = vmax.f32 %v95_v12, %v288_v11  ;;  %v67_v49 = vsel %vm66_vm3, %v46_v3, %v61_v47  ;;  %v109_v51 = vsel %vm108_vm4, %v91_v7, %v103_v48  ;;  %vm120_vm7 = vcmp.eq.s32.totalorder %v87_v45, 3 }
  0x25   :  { %v52_v18 = vmul.f32 1.442695, %v51_v13  ;;  %v57_v19 = vmul.f32 1.442695, %v56_v14  ;;  %v63_v20 = vmul.f32 1.442695, %v62_v15  ;;  %v73_v53 = vsel %vm72_vm5, %v283_v4, %v67_v49  ;;  %p238_p13 = por %p237_p12, %p236_p11 }
  0x26   :  { %v69_v21 = vmul.f32 1.442695, %v68_v16  ;;  %v99_v22 = vsub.f32 %v89_v6, %v98_v17  ;;  %v104_v23 = vsub.f32 %v91_v7, %v98_v17  ;;  %v110_v24 = vsub.f32 %v285_v8, %v98_v17 }
  0x27   :  { %167 = vpow2.f32 %v52_v18  ;;  %v116_v25 = vsub.f32 %v288_v11, %v98_v17  ;;  %v115_v55 = vsel %vm114_vm6, %v285_v8, %v109_v51  ;;  %vm80_vm8 = vcmp.ne.s32.totalorder %v40_v42, 255  ;;  %p239_p0 = pnand %p238_p13, %p232_p10 }
  0x28   :  { %169 = vpow2.f32 %v57_v19  ;;  %v100_v26 = vmul.f32 1.442695, %v99_v22  ;;  %v105_v27 = vmul.f32 1.442695, %v104_v23  ;;  %v111_v28 = vmul.f32 1.442695, %v110_v24 }
  0x29   :  { %171 = vpow2.f32 %v63_v20  ;;  %v117_v29 = vmul.f32 1.442695, %v116_v25  ;;  %v121_v59 = vsel %vm120_vm7, %v288_v11, %v115_v55  ;;  %vm128_vm9 = vcmp.ne.s32.totalorder %v87_v45, 255 }
  0x2a   :  { %173 = vpow2.f32 %v69_v21 }
  0x2b   :  { %175 = vpow2.f32 %v100_v26 }
  0x2c   :  { %177 = vpow2.f32 %v105_v27 }
  0x2d   :  { %179 = vpow2.f32 %v111_v28 }
  0x2e   :  { %181 = vpow2.f32 %v117_v29 }
  0x34   :  { %v168_v30 = vpop.eup %167 }
  0x35   :  { %v170_v31 = vpop.eup %169 }
  0x36   :  { %v172_v32 = vpop.eup %171  ;;  %v59_v33 = vadd.f32 %v170_v31, %v168_v30 }
  0x37   :  { %v174_v34 = vpop.eup %173 }
  0x38   :  { %v176_v35 = vpop.eup %175  ;;  %v65_v36 = vadd.f32 %v172_v32, %v59_v33 }
  0x39   :  { %v178_v37 = vpop.eup %177 }
  0x3a   :  { %v180_v38 = vpop.eup %179  ;;  %v71_v39 = vadd.f32 %v174_v34, %v65_v36  ;;  %v107_v40 = vadd.f32 %v178_v37, %v176_v35 }
  0x3b   :  { %v182_v41 = vpop.eup %181 }
  0x3c   :  { %183 = vlog2.f32 %v71_v39  ;;  %v113_v43 = vadd.f32 %v180_v38, %v107_v40 }
  0x3e   :  { %v119_v44 = vadd.f32 %v182_v41, %v113_v43 }
  0x40   :  { %185 = vlog2.f32 %v119_v44 }
  0x49   :  { %v184_v50 = vpop.eup %183 }
  0x4a   :  { %v75_v52 = vmul.f32 0.6931472, %v184_v50 }
  0x4c   :  { %v76_v54 = vadd.f32 %v75_v52, %v50_v10 }
  0x4d   :  { %v186_v56 = vpop.eup %185 }
  0x4e   :  { %v77_v57 = vsub.f32 %v73_v53, %v76_v54  ;;  %v123_v58 = vmul.f32 0.6931472, %v186_v56 }
  0x50   :  { %v78_v60 = vmul.f32 1.442695, %v77_v57  ;;  %v124_v61 = vadd.f32 %v123_v58, %v98_v17  ;;  %v81_v2 = vsub.f32 0.0, %v77_v57 }
  0x52   :  { %187 = vpow2.f32 %v78_v60  ;;  %v125_v62 = vsub.f32 %v121_v59, %v124_v61  ;;  %v82_v7 = vsel %vm80_vm8, %v81_v2, 0.0 }
  0x54   :  { %v126_v63 = vmul.f32 1.442695, %v125_v62  ;;  %v129_v3 = vsub.f32 0.0, %v125_v62 }
  0x56   :  { %189 = vpow2.f32 %v126_v63  ;;  %v130_v8 = vsel %vm128_vm9, %v129_v3, 0.0 }
  0x57   :  { %v134_v12 = vadd.f32 %v130_v8, %v82_v7 }
  0x5f   :  { %v188_v0 = vpop.eup %187 }
  0x60   :  { %v83_v1 = vsub.f32 1.0, %v188_v0 }
  0x62   :  { %v84_v4 = vmax.f32 %v83_v1, 0.0 }
  0x63   :  { %v190_v5 = vpop.eup %189 }
  0x64   :  { %v131_v6 = vsub.f32 1.0, %v190_v5  ;;  %v85_v9 = vmul.f32 %v84_v4, %v84_v4 }
  0x66   :  { %v132_v10 = vmax.f32 %v131_v6, 0.0 }
  0x68   :  { %v133_v11 = vmul.f32 %v132_v10, %v132_v10 }
  0x6a   :  { %v135_v13 = vadd.f32 %v133_v11, %v85_v9 }
  0x6c   :  { %v136_v14 = vmul.f32 %v135_v13, %v134_v12 }
  0x6e   :  { %v138_v15 = vsel %vm137_vm10, %v136_v14, 0.0 }
  0x6f   :  { %v139_v16 = vrot.slane %v138_v15, 4 }
  0x71   :  { %v140_v17 = vadd.f32 %v139_v16, %v138_v15 }
  0x73   :  { %v141_v18 = vrot.slane %v140_v17, 2 }
  0x75   :  { %v142_v19 = vadd.f32 %v141_v18, %v140_v17 }
  0x77   :  { %v143_v20 = vrot.slane %v142_v19, 1 }
  0x79   :  { %v144_v21 = vadd.f32 %v143_v20, %v142_v19 }
  0x7b   :  { %145 = vst [vmem:[#allocation7] sm:$0x1] %v144_v21 }
  0x7c   :  { %242 = shalt.err (!%p239_p0)
}
  0x7d   :  { %155 = dma.vmem_to_hbm [thread:$0]  %s153_s1, 16, %s303_s2, [#allocation4]  }
  0x7e   :  { %255 = dma.done.wait [#allocation4], 16  }
  0x7f   :  { %256 = vsyncadd [#allocation4], 4294967280 }
  0x80   :  { %159 = vsyncpa [#allocation3], 1 }
  0x81   :  { %160 = vsyncpa [#allocation6], 1 }
  0x82   :  { %161 = vsyncpa [#allocation4], 1 }

</bundles_post_ra>
